<compile_context>
chip_gen: v5e
topology: v5e:2x2
jax: 0.10.0
libtpu: 0.0.40
codegen_flags: <defaults>
</compile_context>

<pallas_src>
import jax
import jax.numpy as jnp
from jax.experimental import pallas as pl
from jax.experimental.pallas import tpu as pltpu


def _round_up(x, m):
    return (x + m - 1) // m * m


def _td_linear_kernel(x_ref, w_ref, b_ref, o_ref, acc_ref):
    # x_ref: (tm, tk)   w_ref: (tk, tn)   b_ref: (1, tn)
    # o_ref: (tm, tn)   acc_ref: (tm, tn) f32 scratch (lives across K steps)
    k = pl.program_id(2)

    @pl.when(k == 0)
    def _():
        acc_ref[...] = jnp.zeros_like(acc_ref)

    acc_ref[...] += jnp.dot(
        x_ref[...], w_ref[...], preferred_element_type=jnp.float32
    )

    @pl.when(k == pl.num_programs(2) - 1)
    def _():
        # Bias added once per output tile, in the K-loop epilogue.
        o_ref[...] = (acc_ref[...] + b_ref[...]).astype(o_ref.dtype)


def _fused_linear(x2d, w, b):
    """y2d = x2d @ w + b, tiled for the MXU.  x2d: (M, D_in)."""
    M, D_in = x2d.shape
    D_out = w.shape[1]

    # Tile sizes: lane dims multiples of 128, sublane dim multiple of 8.
    tm = 256 if M >= 256 else _round_up(M, 8)
    tk = 512 if D_in >= 512 else _round_up(D_in, 128)
    tn = 512 if D_out >= 512 else _round_up(D_out, 128)

    M_pad = _round_up(M, tm)
    K_pad = _round_up(D_in, tk)
    N_pad = _round_up(D_out, tn)

    # Zero-pad (extra K columns are zero in both x and W -> contribute nothing;
    # extra M rows / N columns are sliced off afterwards).
    xp = jnp.pad(x2d, ((0, M_pad - M), (0, K_pad - D_in)))
    wp = jnp.pad(w, ((0, K_pad - D_in), (0, N_pad - D_out)))
    bp = jnp.pad(b, ((0, 0), (0, N_pad - D_out)))

    grid = (M_pad // tm, N_pad // tn, K_pad // tk)

    out = pl.pallas_call(
        _td_linear_kernel,
        out_shape=jax.ShapeDtypeStruct((M_pad, N_pad), x2d.dtype),
        grid_spec=pltpu.PrefetchScalarGridSpec(
            num_scalar_prefetch=0,
            grid=grid,
            in_specs=[
                pl.BlockSpec((tm, tk), lambda i, j, k: (i, k)),
                pl.BlockSpec((tk, tn), lambda i, j, k: (k, j)),
                pl.BlockSpec((1, tn), lambda i, j, k: (0, j)),
            ],
            out_specs=pl.BlockSpec((tm, tn), lambda i, j, k: (i, j)),
            scratch_shapes=[pltpu.VMEM((tm, tn), jnp.float32)],
        ),
        compiler_params=pltpu.CompilerParams(
            # M/N tiles are independent (sharded across v7x's 2 TCs);
            # K is the reduction axis.
            dimension_semantics=("parallel", "parallel", "arbitrary"),
        ),
    )(xp, wp, bp)

    return out[:M, :D_out]


def time_distributed_linear(x, w, b, *, batch_first=False):
    """Apply a Linear layer to every temporal slice of x.

    x : (T, B, D_in)  if batch_first=False   (default, like the PyTorch module)
        (B, T, D_in)  if batch_first=True
    w : (D_in, D_out)   (transposed torch weight)
    b : (1, D_out)
    """
    # A per-row linear is row-order independent, so both layouts reduce to a
    # plain reshape -- no HBM-round-trip transpose needed for batch_first.
    A0, A1, D_in = x.shape
    D_out = w.shape[1]

    x2d = x.reshape(A0 * A1, D_in)
    y2d = _fused_linear(x2d, w, b)
    return y2d.reshape(A0, A1, D_out)
    # TODO(synk): PackedSequence (pack_padded_sequence / pad_packed_sequence)
    # has no Pallas equivalent; only the dense-tensor path is implemented.


if __name__ == "__main__":
    # Small shapes consistent with the module's (Seq, BS, feat) convention.
    T, B, D_IN, D_OUT = 8, 4, 32, 32

    key = jax.random.PRNGKey(0)
    kx, kw, kb = jax.random.split(key, 3)

    x = jax.random.normal(kx, (T, B, D_IN), dtype=jnp.float32)
    # Deterministic synthetic Linear parameters (shapes from nn.Linear(D_IN, D_OUT)).
    w = jax.random.normal(kw, (D_IN, D_OUT), dtype=jnp.float32) * 0.1
    b = jax.random.normal(kb, (1, D_OUT), dtype=jnp.float32) * 0.1

    # seq-first path (batch_first=False, the module default)
    out = time_distributed_linear(x, w, b, batch_first=False)
    out = jax.block_until_ready(out)

    ref = jnp.stack([xt @ w + b[0] for xt in x], axis=0)
    assert out.shape == (T, B, D_OUT), out.shape
    assert jnp.allclose(out, ref, atol=1e-5, rtol=1e-5), "mismatch vs reference"

    # batch_first path: input (B, T, D_in), output (B, T, D_out)
    x_bf = jnp.transpose(x, (1, 0, 2))
    out_bf = time_distributed_linear(x_bf, w, b, batch_first=True)
    out_bf = jax.block_until_ready(out_bf)
    assert out_bf.shape == (B, T, D_OUT), out_bf.shape
    assert jnp.allclose(out_bf, jnp.transpose(ref, (1, 0, 2)),
                        atol=1e-5, rtol=1e-5), "mismatch vs reference (batch_first)"

    print("KERNEL_OK")
</pallas_src>

<mosaic_0001>
module attributes {stable_mosaic.version = 11 : i64} {
  func.func @_td_linear_kernel(%arg0: i32, %arg1: i32, %arg2: i32, %arg3: memref<32x128xf32, #tpu.memory_space<vmem>>, %arg4: memref<128x128xf32, #tpu.memory_space<vmem>>, %arg5: memref<1x128xf32, #tpu.memory_space<vmem>>, %arg6: memref<32x128xf32, #tpu.memory_space<vmem>>, %arg7: memref<32x128xf32, #tpu.memory_space<vmem>>) attributes {dimension_semantics = [#tpu.dimension_semantics<parallel>, #tpu.dimension_semantics<parallel>, #tpu.dimension_semantics<arbitrary>], iteration_bounds = array<i64: 1, 1, 1>, scalar_prefetch = 0 : i64, scratch_operands = 1 : i64, tpu.core_type = #tpu.core_type<tc>, window_params = [{transform_indices = @transform_0, window_bounds = array<i64: 32, 128>}, {transform_indices = @transform_1, window_bounds = array<i64: 128, 128>}, {transform_indices = @transform_2, window_bounds = array<i64: 1, 128>}, {transform_indices = @transform_3, window_bounds = array<i64: 32, 128>}]} {
    %c0_i32 = arith.constant 0 : i32
    %0 = arith.cmpi eq, %arg2, %c0_i32 : i32
    %1 = arith.extui %0 : i1 to i32
    %c0_i32_0 = arith.constant 0 : i32
    %2 = arith.cmpi ne, %1, %c0_i32_0 : i32
    scf.if %2 {
      %cst_10 = arith.constant 0.000000e+00 : f32
      %12 = vector.broadcast %cst_10 : f32 to vector<32x128xf32>
      %c0_11 = arith.constant 0 : index
      %c0_12 = arith.constant 0 : index
      %13 = vector.load %arg7[%c0_11, %c0_12] : memref<32x128xf32, #tpu.memory_space<vmem>>, vector<32x128xf32>
      tpu.vector_store %arg7[%c0_11, %c0_12], %12 {strides = array<i32>} : memref<32x128xf32, #tpu.memory_space<vmem>>, vector<32x128xf32>,
    } else {
    }
    %c0 = arith.constant 0 : index
    %c0_1 = arith.constant 0 : index
    %3 = vector.load %arg7[%c0, %c0_1] : memref<32x128xf32, #tpu.memory_space<vmem>>, vector<32x128xf32>
    %c0_2 = arith.constant 0 : index
    %c0_3 = arith.constant 0 : index
    %4 = vector.load %arg3[%c0_2, %c0_3] : memref<32x128xf32, #tpu.memory_space<vmem>>, vector<32x128xf32>
    %c0_4 = arith.constant 0 : index
    %c0_5 = arith.constant 0 : index
    %5 = vector.load %arg4[%c0_4, %c0_5] : memref<128x128xf32, #tpu.memory_space<vmem>>, vector<128x128xf32>
    %cst = arith.constant dense<0.000000e+00> : vector<32x128xf32>
    %6 = tpu.matmul %4, %5, %cst {dimension_numbers = #tpu.dot_dimension_numbers<[1], [0], [0], [1], [0, 0, 1, 1], [], []>} : vector<32x128xf32>, vector<128x128xf32>, vector<32x128xf32> -> vector<32x128xf32>
    %7 = arith.addf %3, %6 : vector<32x128xf32>
    %c0_6 = arith.constant 0 : index
    %c0_7 = arith.constant 0 : index
    %8 = vector.load %arg7[%c0_6, %c0_7] : memref<32x128xf32, #tpu.memory_space<vmem>>, vector<32x128xf32>
    tpu.vector_store %arg7[%c0_6, %c0_7], %7 {strides = array<i32>} : memref<32x128xf32, #tpu.memory_space<vmem>>, vector<32x128xf32>,
    %c0_i32_8 = arith.constant 0 : i32
    %9 = arith.cmpi eq, %arg2, %c0_i32_8 : i32
    %10 = arith.extui %9 : i1 to i32
    %c0_i32_9 = arith.constant 0 : i32
    %11 = arith.cmpi ne, %10, %c0_i32_9 : i32
    scf.if %11 {
      %c0_10 = arith.constant 0 : index
      %c0_11 = arith.constant 0 : index
      %12 = vector.load %arg7[%c0_10, %c0_11] : memref<32x128xf32, #tpu.memory_space<vmem>>, vector<32x128xf32>
      %c0_12 = arith.constant 0 : index
      %c0_13 = arith.constant 0 : index
      %13 = vector.load %arg5[%c0_12, %c0_13] : memref<1x128xf32, #tpu.memory_space<vmem>>, vector<1x128xf32>
      %14 = vector.broadcast %13 : vector<1x128xf32> to vector<32x128xf32>
      %15 = arith.addf %12, %14 : vector<32x128xf32>
      %c0_14 = arith.constant 0 : index
      %c0_15 = arith.constant 0 : index
      %16 = vector.load %arg6[%c0_14, %c0_15] : memref<32x128xf32, #tpu.memory_space<vmem>>, vector<32x128xf32>
      tpu.vector_store %arg6[%c0_14, %c0_15], %15 {strides = array<i32>} : memref<32x128xf32, #tpu.memory_space<vmem>>, vector<32x128xf32>,
    } else {
    }
    return
  }
  func.func @transform_0(%arg0: i32, %arg1: i32, %arg2: i32) -> (i32, i32) {
    %c0_i32 = arith.constant 0 : i32
    return %arg0, %arg2 : i32, i32
  }
  func.func @transform_1(%arg0: i32, %arg1: i32, %arg2: i32) -> (i32, i32) {
    %c0_i32 = arith.constant 0 : i32
    return %arg2, %arg1 : i32, i32
  }
  func.func @transform_2(%arg0: i32, %arg1: i32, %arg2: i32) -> (i32, i32) {
    %c0_i32 = arith.constant 0 : i32
    %c0_i32_0 = arith.constant 0 : i32
    return %c0_i32, %arg1 : i32, i32
  }
  func.func @transform_3(%arg0: i32, %arg1: i32, %arg2: i32) -> (i32, i32) {
    %c0_i32 = arith.constant 0 : i32
    return %arg0, %arg1 : i32, i32
  }
}

</mosaic_0001>

<bundles_post_ra>
// kernel: tpu_custom_call.1
= control target key start
LH: loop header
LB: loop body
LE: loop exit
PB: predicated region body
PF: predicated region fallthrough
CT: control target
= control target key end

     0   :  { %8 = vsyncpa [#allocation4], 0  ;;  %s333_s0 = inlined_call_operand.hbm [shape: f32[32,128], index: 0, kind: input, shape index: {}]   ;;  %s334_s1 = inlined_call_operand.hbm [shape: f32[128,128], index: 1, kind: input, shape index: {}]   ;;  %s335_s2 = inlined_call_operand.vmem [shape: f32[1,128], index: 2, kind: input, shape index: {}]   ;;  %s336_s3 = inlined_call_operand.hbm [shape: f32[32,128], index: 3, kind: output, shape index: {}]  }
   0x1   :  { %9 = vsyncpa [#allocation7], 0 }
   0x2   :  { %10 = vsyncpa [#allocation5], 0  ;;  %s15_s14 = sshll.u32 %s333_s0, 4  ;;  %s287_s15 = smov [#allocation3]   ;;  %s16_s14 = int_to_ptr.hbm [resolvable:$true] %s15_s14 }
   0x3   :  { %s17_s16 = sshll.u32 %s287_s15, 4  ;;  %s28_s19 = sshll.u32 %s334_s1, 4  ;;  %s18_s16 = int_to_ptr.vmem [resolvable:$true] %s17_s16  ;;  %s29_s19 = int_to_ptr.hbm [resolvable:$true] %s28_s19 }
   0x4   :  { %s288_s20 = smov 128   ;;  %s289_s21 = smov 8  }
   0x5   :  { %23 = dma.hbm_to_vmem [thread:$0]  %s16_s14, 512, %s18_s16, [#allocation4], %s288_s20, %s288_s20, %s289_s21  }
   0x6   :  { %s290_s22 = smov [#allocation6]  }
   0x7   :  { %s30_s23 = sshll.u32 %s290_s22, 4  ;;  %s31_s23 = int_to_ptr.vmem [resolvable:$true] %s30_s23 }
   0x8   :  { %36 = dma.hbm_to_vmem [thread:$0]  %s29_s19, 2048, %s31_s23, [#allocation7], %s288_s20, %s288_s20, %s289_s21  }
   0x9   :  { %281 = dma.done.wait [#allocation4], 512  }
   0xa   :  { %282 = vsyncadd [#allocation4], 4294966784 }
   0xb   :  { %283 = dma.done.wait [#allocation7], 2048  }
   0xc   :  { %284 = vsyncadd [#allocation7], 4294965248  ;;  %v78_v0 = vld [vmem:[#allocation6 + $0x78] sm:$0xff]  ;;  %v77_v1 = vld [vmem:[#allocation6 + $0x70] sm:$0xff]  ;;  %s291_s24 = smov [#allocation8]   ;;  %s141_s28 = sshll.u32 %s336_s3, 4  ;;  %s142_s28 = int_to_ptr.hbm [resolvable:$true] %s141_s28 }
   0xd   :  { %156 = vmatpush.msra.mxu2 %v78_v0  ;;  %157 = vmatpush.msra.mxu3 %v78_v0  ;;  %v76_v2 = vld [vmem:[#allocation6 + $0x68] sm:$0xff]  ;;  %v75_v3 = vld [vmem:[#allocation6 + $0x60] sm:$0xff]  ;;  %v74_v4 = vld [vmem:[#allocation6 + $0x58] sm:$0xff]  ;;  %s139_s25 = sshll.u32 %s291_s24, 4  ;;  %s140_s25 = int_to_ptr.vmem [resolvable:$true] %s139_s25 }
   0xe   :  { %79 = vmatpush.msra.mxu0 %v78_v0  ;;  %155 = vmatpush.msra.mxu1 %v78_v0  ;;  %v73_v5 = vld [vmem:[#allocation6 + $0x50] sm:$0xff]  ;;  %v72_v6 = vld [vmem:[#allocation6 + $0x48] sm:$0xff]  ;;  %v71_v7 = vld [vmem:[#allocation6 + $0x40] sm:$0xff] }
   0xf   :  { %159 = vmatpush.msra.mxu2 %v77_v1  ;;  %160 = vmatpush.msra.mxu3 %v77_v1  ;;  %v70_v8 = vld [vmem:[#allocation6 + $0x38] sm:$0xff]  ;;  %v69_v9 = vld [vmem:[#allocation6 + $0x30] sm:$0xff]  ;;  %v68_v10 = vld [vmem:[#allocation6 + $0x28] sm:$0xff] }
  0x10   :  { %80 = vmatpush.msra.mxu0 %v77_v1  ;;  %158 = vmatpush.msra.mxu1 %v77_v1  ;;  %v67_v11 = vld [vmem:[#allocation6 + $0x20] sm:$0xff]  ;;  %v66_v12 = vld [vmem:[#allocation6 + $0x18] sm:$0xff]  ;;  %v65_v13 = vld [vmem:[#allocation6 + $0x10] sm:$0xff] }
  0x11   :  { %162 = vmatpush.msra.mxu2 %v76_v2  ;;  %163 = vmatpush.msra.mxu3 %v76_v2  ;;  %v64_v14 = vld [vmem:[#allocation6 + $0x8] sm:$0xff]  ;;  %v63_v15 = vld [vmem:[#allocation6] sm:$0xff]  ;;  %v61_v16 = vld [vmem:[#allocation3 + $0x10] sm:$0xff] }
  0x12   :  { %81 = vmatpush.msra.mxu0 %v76_v2  ;;  %161 = vmatpush.msra.mxu1 %v76_v2  ;;  %v62_v17 = vld [vmem:[#allocation3 + $0x18] sm:$0xff]  ;;  %v59_v18 = vld [vmem:[#allocation3] sm:$0xff]  ;;  %v60_v19 = vld [vmem:[#allocation3 + $0x8] sm:$0xff] }
  0x13   :  { %165 = vmatpush.msra.mxu2 %v75_v3  ;;  %166 = vmatpush.msra.mxu3 %v75_v3  ;;  %v208_v20 = vld [vmem:[%s335_s2] ss:$0 sm:$0xff] }
  0x14   :  { %82 = vmatpush.msra.mxu0 %v75_v3  ;;  %164 = vmatpush.msra.mxu1 %v75_v3 }
  0x15   :  { %168 = vmatpush.msra.mxu2 %v74_v4  ;;  %169 = vmatpush.msra.mxu3 %v74_v4 }
  0x16   :  { %83 = vmatpush.msra.mxu0 %v74_v4  ;;  %167 = vmatpush.msra.mxu1 %v74_v4 }
  0x17   :  { %171 = vmatpush.msra.mxu2 %v73_v5  ;;  %172 = vmatpush.msra.mxu3 %v73_v5 }
  0x18   :  { %84 = vmatpush.msra.mxu0 %v73_v5  ;;  %170 = vmatpush.msra.mxu1 %v73_v5 }
  0x19   :  { %174 = vmatpush.msra.mxu2 %v72_v6  ;;  %175 = vmatpush.msra.mxu3 %v72_v6 }
  0x1a   :  { %85 = vmatpush.msra.mxu0 %v72_v6  ;;  %173 = vmatpush.msra.mxu1 %v72_v6 }
  0x1b   :  { %177 = vmatpush.msra.mxu2 %v71_v7  ;;  %178 = vmatpush.msra.mxu3 %v71_v7 }
  0x1c   :  { %86 = vmatpush.msra.mxu0 %v71_v7  ;;  %176 = vmatpush.msra.mxu1 %v71_v7 }
  0x1d   :  { %180 = vmatpush.msra.mxu2 %v70_v8  ;;  %181 = vmatpush.msra.mxu3 %v70_v8 }
  0x1e   :  { %87 = vmatpush.msra.mxu0 %v70_v8  ;;  %179 = vmatpush.msra.mxu1 %v70_v8 }
  0x1f   :  { %183 = vmatpush.msra.mxu2 %v69_v9  ;;  %184 = vmatpush.msra.mxu3 %v69_v9 }
  0x20   :  { %88 = vmatpush.msra.mxu0 %v69_v9  ;;  %182 = vmatpush.msra.mxu1 %v69_v9 }
  0x21   :  { %186 = vmatpush.msra.mxu2 %v68_v10  ;;  %187 = vmatpush.msra.mxu3 %v68_v10 }
  0x22   :  { %89 = vmatpush.msra.mxu0 %v68_v10  ;;  %185 = vmatpush.msra.mxu1 %v68_v10 }
  0x23   :  { %189 = vmatpush.msra.mxu2 %v67_v11  ;;  %190 = vmatpush.msra.mxu3 %v67_v11 }
  0x24   :  { %90 = vmatpush.msra.mxu0 %v67_v11  ;;  %188 = vmatpush.msra.mxu1 %v67_v11 }
  0x25   :  { %192 = vmatpush.msra.mxu2 %v66_v12  ;;  %193 = vmatpush.msra.mxu3 %v66_v12 }
  0x26   :  { %91 = vmatpush.msra.mxu0 %v66_v12  ;;  %191 = vmatpush.msra.mxu1 %v66_v12 }
  0x27   :  { %195 = vmatpush.msra.mxu2 %v65_v13  ;;  %196 = vmatpush.msra.mxu3 %v65_v13 }
  0x28   :  { %92 = vmatpush.msra.mxu0 %v65_v13  ;;  %194 = vmatpush.msra.mxu1 %v65_v13 }
  0x29   :  { %198 = vmatpush.msra.mxu2 %v64_v14  ;;  %199 = vmatpush.msra.mxu3 %v64_v14 }
  0x2a   :  { %93 = vmatpush.msra.mxu0 %v64_v14  ;;  %197 = vmatpush.msra.mxu1 %v64_v14 }
  0x2b   :  { %201 = vmatpush.msra.mxu2 %v63_v15  ;;  %202 = vmatpush.msra.mxu3 %v63_v15 }
  0x2c   :  { %101 = vmatmul.f32.vlgmr.msra.gmra.mxu2 %v61_v16  ;;  %104 = vmatmul.f32.vlgmr.msra.gmra.mxu3 %v62_v17 }
  0x2d   :  { %94 = vmatpush.msra.mxu0 %v63_v15  ;;  %200 = vmatpush.msra.mxu1 %v63_v15 }
  0x2e   :  { %95 = vmatmul.f32.vlgmr.msra.gmra.mxu0 %v59_v18  ;;  %98 = vmatmul.f32.vlgmr.msra.gmra.mxu1 %v60_v19 }
  0xab   :  { %v96_v21 = vpop.f32.mrf.mxu0  ;;  %v99_v22 = vpop.f32.mrf.mxu1 }
  0xac   :  { %v127_v23 = vadd.f32 %v208_v20, %v96_v21  ;;  %v128_v24 = vadd.f32 %v208_v20, %v99_v22 }
  0xae   :  { %131 = vst [vmem:[#allocation8] sm:$0xff] %v127_v23 }
  0xaf   :  { %132 = vst [vmem:[#allocation8 + $0x8] sm:$0xff] %v128_v24  ;;  %v102_v25 = vpop.f32.mrf.mxu2  ;;  %v105_v26 = vpop.f32.mrf.mxu3 }
  0xb0   :  { %v129_v27 = vadd.f32 %v208_v20, %v102_v25  ;;  %v130_v28 = vadd.f32 %v208_v20, %v105_v26 }
  0xb2   :  { %133 = vst [vmem:[#allocation8 + $0x10] sm:$0xff] %v129_v27 }
  0xb3   :  { %134 = vst [vmem:[#allocation8 + $0x18] sm:$0xff] %v130_v28 }
  0xb4   :  { %147 = dma.vmem_to_hbm [thread:$0]  %s140_s25, 512, %s142_s28, [#allocation5], %s288_s20, %s288_s20, %s289_s21  }
  0xb5   :  { %285 = dma.done.wait [#allocation5], 512  }
  0xb6   :  { %286 = vsyncadd [#allocation5], 4294966784 }
  0xb7   :  { %152 = vsyncpa [#allocation4], 1 }
  0xb8   :  { %153 = vsyncpa [#allocation7], 1 }
  0xb9   :  { %154 = vsyncpa [#allocation5], 1 }

</bundles_post_ra>
